<compile_context>
chip_gen: v5e
topology: v5e:2x2
jax: 0.10.0
libtpu: 0.0.40
codegen_flags: <defaults>
</compile_context>

<pallas_src>
import functools

import jax
import jax.numpy as jnp
from jax import lax
from jax.experimental import pallas as pl
from jax.experimental.pallas import tpu as pltpu


# ---------------------------------------------------------------------------
# helpers
# ---------------------------------------------------------------------------
def _round_up(n, m):
    return ((n + m - 1) // m) * m


def _pick_tile(dim, candidates):
    """Largest candidate that divides `dim`, else the full dim (always a legal block)."""
    for c in candidates:
        if dim % c == 0:
            return c
    return dim


def _tpu_info():
    try:
        return pltpu.get_tpu_info()
    except Exception:
        return None


def _vmem_cap_bytes():
    info = _tpu_info()
    cap = getattr(info, "vmem_capacity_bytes", None) if info is not None else None
    if not cap:
        cap = 64 << 20  # v7x-safe fallback (smallest per-TC VMEM of current chips)
    return int(cap)


def _vmem_limit_bytes(est_bytes):
    cap = int(0.9 * _vmem_cap_bytes())            # leave headroom for compiler scratch
    return int(min(max(2 * est_bytes, 32 << 20), cap))


def _num_parallel_cores():
    """Best-effort TensorCore count (v7x megacore = 2).  Unknown -> 1 (safe default:
    never pays an extra weight pass on single-core chips)."""
    info = _tpu_info()
    for name in ("num_cores", "core_count", "num_tensorcores", "tensorcore_count"):
        v = getattr(info, name, None) if info is not None else None
        try:
            if v is not None and int(v) > 0:
                return int(v)
        except Exception:
            pass
    try:
        v = getattr(jax.devices()[0], "num_cores", None)
        if v is not None and int(v) > 0:
            return int(v)
    except Exception:
        pass
    return 1


# ---------------------------------------------------------------------------
# kernels
# ---------------------------------------------------------------------------
def _shared_kernel(x_ref, w_ref, b_ref, o_ref, *, compute_dtype):
    # x_ref: (tm, tk)   w_ref: (tk, tt)   b_ref: (1, tt) f32   o_ref: (tm, tt) f32 accumulator
    k = pl.program_id(2)

    @pl.when(k == 0)
    def _init():
        # Fold the bias into the accumulator init (output block is revisited across k).
        o_ref[...] = jnp.broadcast_to(b_ref[...], o_ref.shape)

    x = x_ref[...]
    if compute_dtype is not None and x.dtype != compute_dtype:
        x = x.astype(compute_dtype)  # free on VPU; avoids a wrapper-side HBM pass over x
    o_ref[...] += jnp.dot(x, w_ref[...], preferred_element_type=jnp.float32)


def _individual_kernel(x_ref, w_ref, b_ref, o_ref, *, compute_dtype, n_vars):
    # x_ref: (n_vars, tb, tk)   w_ref: (n_vars, tk, tt)   b_ref: (n_vars, 1, tt) f32
    # o_ref: (n_vars, tb, tt) f32 accumulator
    k = pl.program_id(2)

    @pl.when(k == 0)
    def _init():
        o_ref[...] = jnp.broadcast_to(b_ref[...], o_ref.shape)

    x = x_ref[...]
    if compute_dtype is not None and x.dtype != compute_dtype:
        x = x.astype(compute_dtype)
    # n_vars is a small compile-time constant -> static unroll; every dot is a plain
    # (tb, tk) @ (tk, tt) matmul on contiguous leading-axis slabs (no strided gathers,
    # no stack/relayout), accumulated per-var directly into the resident output block.
    for v in range(n_vars):
        o_ref[v] = o_ref[v] + jnp.dot(x[v], w_ref[v], preferred_element_type=jnp.float32)


# ---------------------------------------------------------------------------
# wrappers
# ---------------------------------------------------------------------------
def _shared_head(x2, weight, bias, compute_dtype):
    """x2: (M, nf), weight: (T, nf), bias: (T,)  ->  (M, T) in x2.dtype."""
    M, nf = x2.shape
    T = weight.shape[0]
    out_dtype = x2.dtype

    T_pad = _round_up(T, 128)
    nf_pad = _round_up(nf, 128)
    M_pad = _round_up(M, 8)

    # One-time parameter prep: pad to lane-dense T / 128-multiple K, transpose to (K, N),
    # cast the streamed weight to the compute dtype.
    # TODO(synk): in a real model, prepare the padded/transposed/cast weight once outside
    # the per-step path instead of per call.
    if T_pad != T or nf_pad != nf:
        weight = jnp.pad(weight, ((0, T_pad - T), (0, nf_pad - nf)))
    w_p = weight.T                                             # (nf_pad, T_pad)
    if compute_dtype is not None:
        w_p = w_p.astype(compute_dtype)
    b_p = jnp.pad(bias, (0, T_pad - T)).astype(jnp.float32).reshape(1, T_pad)

    x_p = x2
    if M_pad != M or nf_pad != nf:
        x_p = jnp.pad(x2, ((0, M_pad - M), (0, nf_pad - nf)))  # zero K-pad contributes 0

    tk = _pick_tile(nf_pad, (1024, 512, 256, 128))
    tt = _pick_tile(T_pad, (512, 256, 128))
    # Single M tile -> the weight is streamed from HBM exactly once (mem-bound regime).
    tm = M_pad if M_pad <= 1024 else _pick_tile(M_pad, (1024, 512, 256, 128, 64, 32, 16, 8))

    # v7x megacore only: if there would be a single parallel (m, t) tile, split M in two so
    # both TensorCores get work (costs one extra weight pass; skipped on 1-TC chips).
    if ((M_pad // tm) * (T_pad // tt) == 1 and M_pad % 16 == 0
            and _num_parallel_cores() >= 2):
        tm = M_pad // 2

    grid = (M_pad // tm, T_pad // tt, nf_pad // tk)

    x_item = jnp.dtype(x_p.dtype).itemsize
    w_item = jnp.dtype(w_p.dtype).itemsize
    est = (2 * tm * tk * x_item + 2 * tk * tt * w_item + 2 * tt * 4 + 2 * tm * tt * 4)

    out_pad = pl.pallas_call(
        functools.partial(_shared_kernel, compute_dtype=compute_dtype),
        out_shape=jax.ShapeDtypeStruct((M_pad, T_pad), jnp.float32),
        grid=grid,
        in_specs=[
            pl.BlockSpec((tm, tk), lambda m, t, k: (m, k)),   # activations (f32 in HBM)
            pl.BlockSpec((tk, tt), lambda m, t, k: (k, t)),   # weight, (K, N) orientation
            pl.BlockSpec((1, tt), lambda m, t, k: (0, t)),    # bias
        ],
        out_specs=pl.BlockSpec((tm, tt), lambda m, t, k: (m, t)),
        compiler_params=pltpu.CompilerParams(
            dimension_semantics=("parallel", "parallel", "arbitrary"),
            vmem_limit_bytes=_vmem_limit_bytes(est)),
    )(x_p, w_p, b_p)

    out = out_pad[:M, :T] if (M_pad != M or T_pad != T) else out_pad
    return out.astype(out_dtype)


def _individual_head(x3, weight, bias, compute_dtype):
    """x3: (B, n_vars, nf), weight: (n_vars, T, nf), bias: (n_vars, T) -> (B, n_vars, T)."""
    B, n_vars, nf = x3.shape
    T = weight.shape[1]
    out_dtype = x3.dtype

    T_pad = _round_up(T, 128)
    nf_pad = _round_up(nf, 128)

    # Hoisted layout prep (one pass, outside the hot loop): x -> (n_vars, B, nf_pad) so the
    # kernel sees contiguous per-var slabs; weights -> (n_vars, nf_pad, T_pad) for (K, N)
    # contraction; weight cast to the streaming dtype.
    # TODO(synk): prepare padded/transposed/cast parameters once outside the step in a real model.
    x_t = jnp.transpose(x3, (1, 0, 2))
    if nf_pad != nf:
        x_t = jnp.pad(x_t, ((0, 0), (0, 0), (0, nf_pad - nf)))
    w_full = weight
    if T_pad != T or nf_pad != nf:
        w_full = jnp.pad(weight, ((0, 0), (0, T_pad - T), (0, nf_pad - nf)))
    w_p = jnp.transpose(w_full, (0, 2, 1))                     # (n_vars, nf_pad, T_pad)
    if compute_dtype is not None:
        w_p = w_p.astype(compute_dtype)
    b_p = jnp.pad(bias, ((0, 0), (0, T_pad - T))).astype(jnp.float32)
    b_p = b_p.reshape(n_vars, 1, T_pad)

    tk = _pick_tile(nf_pad, (1024, 512, 256, 128))
    tt = _pick_tile(T_pad, (512, 256, 128))
    # Tile B: parallel axis for megacore + keeps x/out blocks bounded under v7x's 64 MiB.
    tb = B if B <= 256 else _pick_tile(B, (256, 128, 64, 32, 16, 8))

    grid = (B // tb, T_pad // tt, nf_pad // tk)

    x_item = jnp.dtype(x_t.dtype).itemsize
    w_item = jnp.dtype(w_p.dtype).itemsize
    est = (2 * n_vars * tb * tk * x_item + 2 * n_vars * tk * tt * w_item
           + 2 * n_vars * tt * 4 + 2 * n_vars * tb * tt * 4)

    out_pad = pl.pallas_call(
        functools.partial(_individual_kernel, compute_dtype=compute_dtype, n_vars=n_vars),
        out_shape=jax.ShapeDtypeStruct((n_vars, B, T_pad), jnp.float32),
        grid=grid,
        in_specs=[
            pl.BlockSpec((n_vars, tb, tk), lambda b, t, k: (0, b, k)),   # activations
            pl.BlockSpec((n_vars, tk, tt), lambda b, t, k: (0, k, t)),   # weights
            pl.BlockSpec((n_vars, 1, tt), lambda b, t, k: (0, 0, t)),    # biases
        ],
        out_specs=pl.BlockSpec((n_vars, tb, tt), lambda b, t, k: (0, b, t)),
        compiler_params=pltpu.CompilerParams(
            dimension_semantics=("parallel", "parallel", "arbitrary"),
            vmem_limit_bytes=_vmem_limit_bytes(est)),
    )(x_t, w_p, b_p)

    out = jnp.transpose(out_pad, (1, 0, 2))
    if T_pad != T:
        out = out[:, :, :T]
    return out.astype(out_dtype)


def flatten_head_forward(x, weight, bias, individual, compute_dtype=jnp.bfloat16):
    """Pallas implementation of Flatten_Head.forward.

    x:      [B, n_vars, d_model, patch_num]
    weight: [n_vars, T, nf] if individual else [T, nf]   (PyTorch nn.Linear layout)
    bias:   [n_vars, T]     if individual else [T]
    compute_dtype: weight/activation streaming dtype (default bf16; the kernel always
                   accumulates in f32). Pass None for a pure-f32 path.
    returns [B, n_vars, T]
    """
    B, n_vars, d_model, patch_num = x.shape
    nf = d_model * patch_num

    # nn.Flatten(start_dim=-2) -- contiguous reshape, no copy.
    z = x.reshape(B, n_vars, nf)

    # head_dropout=0 -> dropout is the identity (eval semantics), so it is omitted.
    if individual:
        return _individual_head(z, weight, bias, compute_dtype)
    # shared head: collapse (B, n_vars) into a single M axis (free reshape) -> one matmul.
    out2 = _shared_head(z.reshape(B * n_vars, nf), weight, bias, compute_dtype)
    return out2.reshape(B, n_vars, out2.shape[-1])


# ---------------------------------------------------------------------------
# demo / self-check
# ---------------------------------------------------------------------------
if __name__ == "__main__":
    key = jax.random.PRNGKey(0)
    B, n_vars, d_model, patch_num, T = 2, 4, 16, 8, 32
    nf = d_model * patch_num

    k1, k2, k3, k4, k5 = jax.random.split(key, 5)
    x = jax.random.normal(k1, (B, n_vars, d_model, patch_num), jnp.float32)

    # deterministic "parameters" (synthetic init, not a checkpoint)
    w_shared = jax.random.normal(k2, (T, nf), jnp.float32) * (1.0 / jnp.sqrt(nf))
    b_shared = jax.random.normal(k3, (T,), jnp.float32) * 0.1
    w_ind = jax.random.normal(k4, (n_vars, T, nf), jnp.float32) * (1.0 / jnp.sqrt(nf))
    b_ind = jax.random.normal(k5, (n_vars, T), jnp.float32) * 0.1

    # default (bf16 streaming, f32 accumulate) and pure-f32 paths, both head variants
    y_shared = flatten_head_forward(x, w_shared, b_shared, individual=False)
    y_ind = flatten_head_forward(x, w_ind, b_ind, individual=True)
    y_shared_f32 = flatten_head_forward(x, w_shared, b_shared, individual=False,
                                        compute_dtype=None)
    y_ind_f32 = flatten_head_forward(x, w_ind, b_ind, individual=True,
                                     compute_dtype=None)
    jax.block_until_ready((y_shared, y_ind, y_shared_f32, y_ind_f32))

    # reference check (plain JAX, high-precision matmul)
    z = x.reshape(B, n_vars, nf)
    ref_shared = jnp.einsum("bvk,tk->bvt", z, w_shared,
                            precision=lax.Precision.HIGHEST) + b_shared
    ref_ind = jnp.einsum("bvk,vtk->bvt", z, w_ind,
                         precision=lax.Precision.HIGHEST) + b_ind[None]

    assert y_shared.shape == (B, n_vars, T) and y_ind.shape == (B, n_vars, T)
    assert jnp.allclose(y_shared_f32, ref_shared, atol=2e-3, rtol=2e-3)
    assert jnp.allclose(y_ind_f32, ref_ind, atol=2e-3, rtol=2e-3)
    assert jnp.allclose(y_shared, ref_shared, atol=5e-2, rtol=5e-2)
    assert jnp.allclose(y_ind, ref_ind, atol=5e-2, rtol=5e-2)

    print("KERNEL_OK")
</pallas_src>

<mosaic_0001>
module attributes {stable_mosaic.version = 11 : i64} {
  func.func @_shared_kernel(%arg0: i32, %arg1: i32, %arg2: i32, %arg3: memref<8x128xf32, #tpu.memory_space<vmem>>, %arg4: memref<128x128xbf16, #tpu.memory_space<vmem>>, %arg5: memref<1x128xf32, #tpu.memory_space<vmem>>, %arg6: memref<8x128xf32, #tpu.memory_space<vmem>>) attributes {dimension_semantics = [#tpu.dimension_semantics<parallel>, #tpu.dimension_semantics<parallel>, #tpu.dimension_semantics<arbitrary>], iteration_bounds = array<i64: 1, 1, 1>, scalar_prefetch = 0 : i64, scratch_operands = 0 : i64, tpu.core_type = #tpu.core_type<tc>, window_params = [{transform_indices = @transform_0, window_bounds = array<i64: 8, 128>}, {transform_indices = @transform_1, window_bounds = array<i64: 128, 128>}, {transform_indices = @transform_2, window_bounds = array<i64: 1, 128>}, {transform_indices = @transform_3, window_bounds = array<i64: 8, 128>}]} {
    %c0_i32 = arith.constant 0 : i32
    %0 = arith.cmpi eq, %arg2, %c0_i32 : i32
    %1 = arith.extui %0 : i1 to i32
    %c0_i32_0 = arith.constant 0 : i32
    %2 = arith.cmpi ne, %1, %c0_i32_0 : i32
    scf.if %2 {
      %c0_8 = arith.constant 0 : index
      %c0_9 = arith.constant 0 : index
      %10 = vector.load %arg5[%c0_8, %c0_9] : memref<1x128xf32, #tpu.memory_space<vmem>>, vector<1x128xf32>
      %11 = vector.shape_cast %10 : vector<1x128xf32> to vector<1x128xf32>
      %12 = vector.broadcast %11 : vector<1x128xf32> to vector<8x128xf32>
      %c0_10 = arith.constant 0 : index
      %c0_11 = arith.constant 0 : index
      %13 = vector.load %arg6[%c0_10, %c0_11] : memref<8x128xf32, #tpu.memory_space<vmem>>, vector<8x128xf32>
      tpu.vector_store %arg6[%c0_10, %c0_11], %12 {strides = array<i32>} : memref<8x128xf32, #tpu.memory_space<vmem>>, vector<8x128xf32>,
    } else {
    }
    %c0 = arith.constant 0 : index
    %c0_1 = arith.constant 0 : index
    %3 = vector.load %arg3[%c0, %c0_1] : memref<8x128xf32, #tpu.memory_space<vmem>>, vector<8x128xf32>
    %4 = arith.truncf %3 : vector<8x128xf32> to vector<8x128xbf16>
    %c0_2 = arith.constant 0 : index
    %c0_3 = arith.constant 0 : index
    %5 = vector.load %arg6[%c0_2, %c0_3] : memref<8x128xf32, #tpu.memory_space<vmem>>, vector<8x128xf32>
    %c0_4 = arith.constant 0 : index
    %c0_5 = arith.constant 0 : index
    %6 = vector.load %arg4[%c0_4, %c0_5] : memref<128x128xbf16, #tpu.memory_space<vmem>>, vector<128x128xbf16>
    %cst = arith.constant dense<0.000000e+00> : vector<8x128xf32>
    %7 = tpu.matmul %4, %6, %cst {dimension_numbers = #tpu.dot_dimension_numbers<[1], [0], [0], [1], [0, 0, 1, 1], [], []>} : vector<8x128xbf16>, vector<128x128xbf16>, vector<8x128xf32> -> vector<8x128xf32>
    %8 = arith.addf %5, %7 : vector<8x128xf32>
    %c0_6 = arith.constant 0 : index
    %c0_7 = arith.constant 0 : index
    %9 = vector.load %arg6[%c0_6, %c0_7] : memref<8x128xf32, #tpu.memory_space<vmem>>, vector<8x128xf32>
    tpu.vector_store %arg6[%c0_6, %c0_7], %8 {strides = array<i32>} : memref<8x128xf32, #tpu.memory_space<vmem>>, vector<8x128xf32>,
    return
  }
  func.func @transform_0(%arg0: i32, %arg1: i32, %arg2: i32) -> (i32, i32) {
    %c0_i32 = arith.constant 0 : i32
    return %arg0, %arg2 : i32, i32
  }
  func.func @transform_1(%arg0: i32, %arg1: i32, %arg2: i32) -> (i32, i32) {
    %c0_i32 = arith.constant 0 : i32
    return %arg2, %arg1 : i32, i32
  }
  func.func @transform_2(%arg0: i32, %arg1: i32, %arg2: i32) -> (i32, i32) {
    %c0_i32 = arith.constant 0 : i32
    %c0_i32_0 = arith.constant 0 : i32
    return %c0_i32, %arg1 : i32, i32
  }
  func.func @transform_3(%arg0: i32, %arg1: i32, %arg2: i32) -> (i32, i32) {
    %c0_i32 = arith.constant 0 : i32
    return %arg0, %arg1 : i32, i32
  }
}

</mosaic_0001>

<bundles_post_ra>
// kernel: tpu_custom_call.1
= control target key start
LH: loop header
LB: loop body
LE: loop exit
PB: predicated region body
PF: predicated region fallthrough
CT: control target
= control target key end

     0   :  { %8 = vsyncpa [#allocation3], 0  ;;  %s315_s0 = inlined_call_operand.hbm [shape: f32[8,128], index: 0, kind: input, shape index: {}]   ;;  %s316_s1 = inlined_call_operand.hbm [shape: bf16[128,128], index: 1, kind: input, shape index: {}]   ;;  %s317_s2 = inlined_call_operand.vmem [shape: f32[1,128], index: 2, kind: input, shape index: {}]   ;;  %s318_s3 = inlined_call_operand.hbm [shape: f32[8,128], index: 3, kind: output, shape index: {}]  }
   0x1   :  { %9 = vsyncpa [#allocation6], 0 }
   0x2   :  { %10 = vsyncpa [#allocation4], 0  ;;  %s16_s14 = sshll.u32 %s315_s0, 4  ;;  %s278_s15 = smov [#allocation2]   ;;  %s17_s14 = int_to_ptr.hbm [resolvable:$true] %s16_s14 }
   0x3   :  { %s18_s16 = sshll.u32 %s278_s15, 4  ;;  %s26_s19 = sshll.u32 %s316_s1, 4  ;;  %s19_s16 = int_to_ptr.vmem [resolvable:$true] %s18_s16  ;;  %s27_s19 = int_to_ptr.hbm [resolvable:$true] %s26_s19 }
   0x4   :  { %21 = dma.hbm_to_vmem [thread:$0]  %s17_s14, 128, %s19_s16, [#allocation3]  }
   0x5   :  { %s279_s20 = smov [#allocation5]   ;;  %s280_s22 = smov 64  }
   0x6   :  { %s28_s21 = sshll.u32 %s279_s20, 4  ;;  %s281_s23 = smov 4   ;;  %s29_s21 = int_to_ptr.vmem [resolvable:$true] %s28_s21 }
   0x7   :  { %34 = dma.hbm_to_vmem [thread:$0]  %s27_s19, 1024, %s29_s21, [#allocation6], %s280_s22, %s280_s22, %s281_s23  }
   0x8   :  { %272 = dma.done.wait [#allocation3], 128  }
   0x9   :  { %273 = vsyncadd [#allocation3], 4294967168 }
   0xa   :  { %274 = dma.done.wait [#allocation6], 1024  }
   0xb   :  { %275 = vsyncadd [#allocation6], 4294966272  ;;  %v193_v0 = vld [vmem:[#allocation5 + $0x38] sm:$0xff]  ;;  %v192_v1 = vld [vmem:[#allocation5 + $0x30] sm:$0xff]  ;;  %s282_s24 = smov [#allocation7]   ;;  %s143_s28 = sshll.u32 %s318_s3, 4  ;;  %s144_s28 = int_to_ptr.hbm [resolvable:$true] %s143_s28 }
   0xc   :  { %121 = vmatpush.bf16.msra.mxu0 %v193_v0  ;;  %v191_v2 = vld [vmem:[#allocation5 + $0x28] sm:$0xff]  ;;  %v190_v3 = vld [vmem:[#allocation5 + $0x20] sm:$0xff]  ;;  %v189_v4 = vld [vmem:[#allocation5 + $0x18] sm:$0xff]  ;;  %s141_s25 = sshll.u32 %s282_s24, 4  ;;  %s142_s25 = int_to_ptr.vmem [resolvable:$true] %s141_s25 }
   0xd   :  { %v188_v5 = vld [vmem:[#allocation5 + $0x10] sm:$0xff]  ;;  %v187_v6 = vld [vmem:[#allocation5 + $0x8] sm:$0xff]  ;;  %v186_v7 = vld [vmem:[#allocation5] sm:$0xff] }
   0xe   :  { %v54_v8 = vld [vmem:[#allocation2] sm:$0xff] }
   0xf   :  { %v55_v9 = vpack.c.bf16 %v54_v8, %v54_v8  ;;  %v199_v10 = vld [vmem:[%s317_s2] ss:$0 sm:$0xff] }
  0x10   :  { %122 = vmatpush.bf16.msra.mxu0 %v192_v1 }
  0x14   :  { %123 = vmatpush.bf16.msra.mxu0 %v191_v2 }
  0x18   :  { %124 = vmatpush.bf16.msra.mxu0 %v190_v3 }
  0x1c   :  { %125 = vmatpush.bf16.msra.mxu0 %v189_v4 }
  0x20   :  { %126 = vmatpush.bf16.msra.mxu0 %v188_v5 }
  0x24   :  { %127 = vmatpush.bf16.msra.mxu0 %v187_v6 }
  0x28   :  { %128 = vmatpush.bf16.msra.mxu0 %v186_v7 }
  0x2b   :  { %129 = vmatmul.bf16.vlgmr.msra.gmra.mxu0 %v55_v9 }
  0xa8   :  { %v130_v11 = vpop.f32.mrf.mxu0 }
  0xa9   :  { %v134_v12 = vadd.f32 %v199_v10, %v130_v11 }
  0xab   :  { %135 = vst [vmem:[#allocation7] sm:$0xff] %v134_v12 }
  0xac   :  { %146 = dma.vmem_to_hbm [thread:$0]  %s142_s25, 128, %s144_s28, [#allocation4]  }
  0xb0   :  { %v132_v13 = vpop.f32.mrf.mxu0 }
  0xb1   :  { %276 = dma.done.wait [#allocation4], 128  }
  0xb2   :  { %277 = vsyncadd [#allocation4], 4294967168 }
  0xb3   :  { %151 = vsyncpa [#allocation3], 1 }
  0xb4   :  { %152 = vsyncpa [#allocation6], 1 }
  0xb5   :  { %153 = vsyncpa [#allocation4], 1 }

</bundles_post_ra>
